<compile_context>
chip_gen: v7x
topology: tpu7x:2x2x1
jax: 0.10.0
libtpu: 0.0.40
codegen_flags: <defaults>
</compile_context>

<pallas_src>
import functools

import jax
import jax.numpy as jnp
from jax import lax
from jax.experimental import pallas as pl
from jax.experimental.pallas import tpu as pltpu


# --------------------------------- kernels -----------------------------------
def _se_rows_kernel(x_ref, wd_ref, bd_ref, wu_ref, bu_ref, o_ref, *, inv_hw):
    """Collapsed layout: x_ref/o_ref are (R, HW) with R = imgs_per_block * C.

    wd_ref: (G*Ci, R)  block-diagonal down weight  kron(I_G, W_down)
    bd_ref: (G*Ci, 1)  tiled down bias
    wu_ref: (R, G*Ci)  block-diagonal up weight    kron(I_G, W_up)
    bu_ref: (R, 1)     tiled up bias
    """
    x = x_ref[...]                                                    # (R, HW)
    # Squeeze: mean over the flattened spatial (lane) axis, f32 accumulation.
    s = jnp.sum(x, axis=-1, keepdims=True, dtype=jnp.float32) * inv_hw  # (R, 1)
    # Excite: two tiny mat-vecs directly in the row layout (the block-diagonal
    # weights keep each image's channels independent), ReLU then sigmoid.
    z = jnp.dot(wd_ref[...], s, preferred_element_type=jnp.float32) + bd_ref[...]
    z = jnp.maximum(z, 0.0)                                           # (G*Ci, 1)
    g = jnp.dot(wu_ref[...], z, preferred_element_type=jnp.float32) + bu_ref[...]
    g = jax.nn.sigmoid(g)                                             # (R, 1)
    # Scale: broadcast the per-(image, channel) gate over the spatial lanes.
    o_ref[...] = (x * g.astype(x.dtype)).astype(o_ref.dtype)


def _se_nchw_kernel(x_ref, wd_ref, bd_ref, wu_ref, bu_ref, o_ref, *, inv_hw):
    """Natural layout: x_ref/o_ref are (G, C, HW); weights in PyTorch layout.

    wd_ref: (Ci, C), bd_ref: (1, Ci), wu_ref: (C, Ci), bu_ref: (1, C)
    """
    x = x_ref[...]                                                    # (G, C, HW)
    s = jnp.sum(x, axis=-1, dtype=jnp.float32) * inv_hw               # (G, C)
    # Contraction over the conv "in_channels" axis -> no transposes anywhere.
    z = lax.dot_general(s, wd_ref[...], (((1,), (1,)), ((), ())),
                        preferred_element_type=jnp.float32) + bd_ref[...]   # (G, Ci)
    z = jnp.maximum(z, 0.0)
    g = lax.dot_general(z, wu_ref[...], (((1,), (1,)), ((), ())),
                        preferred_element_type=jnp.float32) + bu_ref[...]   # (G, C)
    g = jax.nn.sigmoid(g)
    o_ref[...] = (x * g[:, :, None].astype(x.dtype)).astype(o_ref.dtype)


# --------------------------------- wrapper ------------------------------------
def _cost_estimate(N, C, Ci, HW, itemsize):
    # Pool + rescale dominate; the 1x1 MLP is negligible. Op is HBM-bound.
    return pl.CostEstimate(
        flops=2 * N * C * HW + 4 * N * C * Ci,
        transcendentals=N * C,                     # sigmoid
        bytes_accessed=2 * N * C * HW * itemsize + (2 * C * Ci + C + Ci) * 4,
    )


def se_block_pallas(x_nchw, w_down, b_down, w_up, b_up,
                    *, block_budget_bytes=2 << 20):
    """SEBlock forward.

    x_nchw: (N, C, H, W)
    w_down: (Ci, C)  b_down: (Ci,)   -- PyTorch Conv2d 1x1 weights, 1x1 squeezed
    w_up  : (C, Ci)  b_up  : (C,)
    """
    N, C, H, W = x_nchw.shape
    Ci = w_down.shape[0]
    # F.avg_pool2d(x, kernel_size=W) is a *global* pool only for square inputs,
    # which is how SEBlock is used inside RepVGG.
    assert H == W, "SEBlock kernel assumes square spatial dims (global avg pool)"
    HW = H * W
    itemsize = jnp.dtype(x_nchw.dtype).itemsize
    per_img_bytes = C * HW * itemsize

    # Largest images-per-block G: divides N, satisfies the alignment predicate,
    # and keeps the block under the (generation-conservative) VMEM budget.
    def pick_group(ok_align):
        best = 0
        for g in range(1, N + 1):
            if N % g == 0 and ok_align(g) and g * per_img_bytes <= block_budget_bytes:
                best = g
        return best

    ce = _cost_estimate(N, C, Ci, HW, itemsize)
    cp = pltpu.CompilerParams(dimension_semantics=("parallel",))

    # --------- path 1: C < 8 -> collapsed, sublane-dense (N*C, HW) layout -----
    use_rows = (C % 8 != 0)
    if use_rows:
        g_rows = pick_group(lambda g: (g * C) % 8 == 0 or g == N)
        use_rows = g_rows > 0
    if use_rows:
        G = g_rows
        R = G * C
        x_rows = x_nchw.reshape(N * C, HW)       # NCHW is (C,HW)-contiguous: free
        # Block-diagonal 1x1 weights let the excite run in the row layout with
        # no in-kernel reshape. In a real module these (and the f32 casts) are
        # precomputed once at init; here they are a handful of tiny XLA ops.
        eye = jnp.eye(G, dtype=jnp.float32)
        wd_blk = jnp.kron(eye, w_down.astype(jnp.float32))            # (G*Ci, R)
        bd_blk = jnp.tile(b_down.astype(jnp.float32), G).reshape(G * Ci, 1)
        wu_blk = jnp.kron(eye, w_up.astype(jnp.float32))              # (R, G*Ci)
        bu_blk = jnp.tile(b_up.astype(jnp.float32), G).reshape(R, 1)

        out_rows = pl.pallas_call(
            functools.partial(_se_rows_kernel, inv_hw=1.0 / HW),
            out_shape=jax.ShapeDtypeStruct((N * C, HW), x_nchw.dtype),
            grid=(N // G,),
            in_specs=[
                pl.BlockSpec((R, HW), lambda i: (i, 0)),
                pl.BlockSpec((G * Ci, R), lambda i: (0, 0)),     # VMEM-resident
                pl.BlockSpec((G * Ci, 1), lambda i: (0, 0)),
                pl.BlockSpec((R, G * Ci), lambda i: (0, 0)),
                pl.BlockSpec((R, 1), lambda i: (0, 0)),
            ],
            out_specs=pl.BlockSpec((R, HW), lambda i: (i, 0)),
            compiler_params=cp,
            cost_estimate=ce,
        )(x_rows, wd_blk, bd_blk, wu_blk, bu_blk)
        return out_rows.reshape(N, C, H, W)

    # --------- path 2: natural (G, C, HW) layout (dense once C % 8 == 0) ------
    G = pick_group(lambda g: True)
    if G == 0:
        G = 1  # one image per step even if it exceeds the soft budget
        # TODO(synk): for C*HW far beyond any RepVGG stage, add a two-phase
        # HW-tiled pool-then-rescale path instead of one whole-image block.
    x3 = x_nchw.reshape(N, C, HW)
    out3 = pl.pallas_call(
        functools.partial(_se_nchw_kernel, inv_hw=1.0 / HW),
        out_shape=jax.ShapeDtypeStruct((N, C, HW), x_nchw.dtype),
        grid=(N // G,),
        in_specs=[
            pl.BlockSpec((G, C, HW), lambda i: (i, 0, 0)),
            pl.BlockSpec((Ci, C), lambda i: (0, 0)),             # VMEM-resident
            pl.BlockSpec((1, Ci), lambda i: (0, 0)),
            pl.BlockSpec((C, Ci), lambda i: (0, 0)),
            pl.BlockSpec((1, C), lambda i: (0, 0)),
        ],
        out_specs=pl.BlockSpec((G, C, HW), lambda i: (i, 0, 0)),
        compiler_params=cp,
        cost_estimate=ce,
    )(x3,
      w_down.astype(jnp.float32), b_down.reshape(1, Ci).astype(jnp.float32),
      w_up.astype(jnp.float32), b_up.reshape(1, C).astype(jnp.float32))
    return out3.reshape(N, C, H, W)


# ----------------------------- pure-JAX reference -----------------------------
def se_block_ref(x, w_down, b_down, w_up, b_up):
    s = jnp.mean(x, axis=(2, 3))                       # (N, C) global average pool
    z = jnp.maximum(s @ w_down.T + b_down, 0.0)        # (N, Ci)
    g = jax.nn.sigmoid(z @ w_up.T + b_up)              # (N, C)
    return x * g[:, :, None, None]


def _run_case(key, N, C, H, W, Ci, **kw):
    kx, kwd, kbd, kwu, kbu = jax.random.split(key, 5)
    x = jax.random.normal(kx, (N, C, H, W), jnp.float32)
    # PyTorch Conv2d(kernel_size=1) parameter layouts with the trailing 1x1 squeezed.
    w_down = jax.random.normal(kwd, (Ci, C), jnp.float32) * 0.5
    b_down = jax.random.normal(kbd, (Ci,), jnp.float32) * 0.1
    w_up = jax.random.normal(kwu, (C, Ci), jnp.float32) * 0.5
    b_up = jax.random.normal(kbu, (C,), jnp.float32) * 0.1

    y = jax.block_until_ready(se_block_pallas(x, w_down, b_down, w_up, b_up, **kw))
    ref = se_block_ref(x, w_down, b_down, w_up, b_up)
    assert jnp.allclose(y, ref, atol=1e-4, rtol=1e-4), (
        f"mismatch vs reference SEBlock (N={N}, C={C}, H={H}, W={W}, Ci={Ci})")


# ----------------------------------- main --------------------------------------
if __name__ == "__main__":
    key = jax.random.PRNGKey(0)
    k0, k1, k2 = jax.random.split(key, 3)

    # Primary case: matches the module shapes (input_channels=4, internal=2).
    _run_case(k0, N=2, C=4, H=16, W=16, Ci=2)
    # Sublane-dense rows path with a multi-step grid (exercises pipelining).
    _run_case(k1, N=4, C=4, H=16, W=16, Ci=2, block_budget_bytes=8 * 1024)
    # Natural (G, C, HW) path (C % 8 == 0) with a multi-step grid.
    _run_case(k2, N=4, C=8, H=16, W=16, Ci=4, block_budget_bytes=16 * 1024)

    print("KERNEL_OK")
</pallas_src>

<mosaic_0001>
module attributes {stable_mosaic.version = 11 : i64} {
  func.func @_se_rows_kernel(%arg0: i32, %arg1: memref<8x256xf32, #tpu.memory_space<vmem>>, %arg2: memref<4x8xf32, #tpu.memory_space<vmem>>, %arg3: memref<4x1xf32, #tpu.memory_space<vmem>>, %arg4: memref<8x4xf32, #tpu.memory_space<vmem>>, %arg5: memref<8x1xf32, #tpu.memory_space<vmem>>, %arg6: memref<8x256xf32, #tpu.memory_space<vmem>>) attributes {dimension_semantics = [#tpu.dimension_semantics<parallel>], iteration_bounds = array<i64: 1>, scalar_prefetch = 0 : i64, scratch_operands = 0 : i64, tpu.core_type = #tpu.core_type<tc>, window_params = [{transform_indices = @transform_0, window_bounds = array<i64: 8, 256>}, {pipeline_mode = #tpu.pipeline_mode<synchronous>, transform_indices = @transform_1, window_bounds = array<i64: 4, 8>}, {pipeline_mode = #tpu.pipeline_mode<synchronous>, transform_indices = @transform_2, window_bounds = array<i64: 4, 1>}, {pipeline_mode = #tpu.pipeline_mode<synchronous>, transform_indices = @transform_3, window_bounds = array<i64: 8, 4>}, {pipeline_mode = #tpu.pipeline_mode<synchronous>, transform_indices = @transform_4, window_bounds = array<i64: 8, 1>}, {transform_indices = @transform_5, window_bounds = array<i64: 8, 256>}]} {
    %c0 = arith.constant 0 : index
    %c0_0 = arith.constant 0 : index
    %0 = vector.load %arg1[%c0, %c0_0] : memref<8x256xf32, #tpu.memory_space<vmem>>, vector<8x256xf32>
    %cst = arith.constant dense<0.000000e+00> : vector<8xf32>
    %1 = vector.multi_reduction <add>, %0, %cst [1] : vector<8x256xf32> to vector<8xf32>
    %2 = vector.shape_cast %1 : vector<8xf32> to vector<8x1xf32>
    %cst_1 = arith.constant 3.906250e-03 : f32
    %3 = vector.broadcast %cst_1 : f32 to vector<8x1xf32>
    %4 = arith.mulf %2, %3 : vector<8x1xf32>
    %c0_2 = arith.constant 0 : index
    %c0_3 = arith.constant 0 : index
    %5 = vector.load %arg2[%c0_2, %c0_3] : memref<4x8xf32, #tpu.memory_space<vmem>>, vector<4x8xf32>
    %cst_4 = arith.constant dense<0.000000e+00> : vector<4x1xf32>
    %6 = tpu.matmul %5, %4, %cst_4 {dimension_numbers = #tpu.dot_dimension_numbers<[1], [0], [0], [1], [0, 0, 1, 1], [], []>} : vector<4x8xf32>, vector<8x1xf32>, vector<4x1xf32> -> vector<4x1xf32>
    %c0_5 = arith.constant 0 : index
    %c0_6 = arith.constant 0 : index
    %7 = vector.load %arg3[%c0_5, %c0_6] : memref<4x1xf32, #tpu.memory_space<vmem>>, vector<4x1xf32>
    %8 = arith.addf %6, %7 : vector<4x1xf32>
    %cst_7 = arith.constant 0.000000e+00 : f32
    %9 = vector.broadcast %cst_7 : f32 to vector<4x1xf32>
    %10 = arith.maximumf %8, %9 : vector<4x1xf32>
    %c0_8 = arith.constant 0 : index
    %c0_9 = arith.constant 0 : index
    %11 = vector.load %arg4[%c0_8, %c0_9] : memref<8x4xf32, #tpu.memory_space<vmem>>, vector<8x4xf32>
    %cst_10 = arith.constant dense<0.000000e+00> : vector<8x1xf32>
    %12 = tpu.matmul %11, %10, %cst_10 {dimension_numbers = #tpu.dot_dimension_numbers<[1], [0], [0], [1], [0, 0, 1, 1], [], []>} : vector<8x4xf32>, vector<4x1xf32>, vector<8x1xf32> -> vector<8x1xf32>
    %c0_11 = arith.constant 0 : index
    %c0_12 = arith.constant 0 : index
    %13 = vector.load %arg5[%c0_11, %c0_12] : memref<8x1xf32, #tpu.memory_space<vmem>>, vector<8x1xf32>
    %14 = arith.addf %12, %13 : vector<8x1xf32>
    %15 = arith.negf %14 : vector<8x1xf32>
    %16 = math.exp %15 : vector<8x1xf32>
    %cst_13 = arith.constant 1.000000e+00 : f32
    %17 = vector.broadcast %cst_13 : f32 to vector<8x1xf32>
    %18 = arith.addf %17, %16 : vector<8x1xf32>
    %19 = arith.divf %17, %18 : vector<8x1xf32>
    %20 = vector.broadcast %19 : vector<8x1xf32> to vector<8x256xf32>
    %21 = arith.mulf %0, %20 : vector<8x256xf32>
    %c0_14 = arith.constant 0 : index
    %c0_15 = arith.constant 0 : index
    %22 = vector.load %arg6[%c0_14, %c0_15] : memref<8x256xf32, #tpu.memory_space<vmem>>, vector<8x256xf32>
    tpu.vector_store %arg6[%c0_14, %c0_15], %21 {strides = array<i32>} : memref<8x256xf32, #tpu.memory_space<vmem>>, vector<8x256xf32>,
    return
  }
  func.func @transform_0(%arg0: i32) -> (i32, i32) {
    %c0_i32 = arith.constant 0 : i32
    %c0_i32_0 = arith.constant 0 : i32
    return %arg0, %c0_i32 : i32, i32
  }
  func.func @transform_1(%arg0: i32) -> (i32, i32) {
    %c0_i32 = arith.constant 0 : i32
    %c0_i32_0 = arith.constant 0 : i32
    %c0_i32_1 = arith.constant 0 : i32
    return %c0_i32, %c0_i32_0 : i32, i32
  }
  func.func @transform_2(%arg0: i32) -> (i32, i32) {
    %c0_i32 = arith.constant 0 : i32
    %c0_i32_0 = arith.constant 0 : i32
    %c0_i32_1 = arith.constant 0 : i32
    return %c0_i32, %c0_i32_0 : i32, i32
  }
  func.func @transform_3(%arg0: i32) -> (i32, i32) {
    %c0_i32 = arith.constant 0 : i32
    %c0_i32_0 = arith.constant 0 : i32
    %c0_i32_1 = arith.constant 0 : i32
    return %c0_i32, %c0_i32_0 : i32, i32
  }
  func.func @transform_4(%arg0: i32) -> (i32, i32) {
    %c0_i32 = arith.constant 0 : i32
    %c0_i32_0 = arith.constant 0 : i32
    %c0_i32_1 = arith.constant 0 : i32
    return %c0_i32, %c0_i32_0 : i32, i32
  }
  func.func @transform_5(%arg0: i32) -> (i32, i32) {
    %c0_i32 = arith.constant 0 : i32
    %c0_i32_0 = arith.constant 0 : i32
    return %arg0, %c0_i32 : i32, i32
  }
}

</mosaic_0001>

<bundles_post_ra>
// kernel: tpu_custom_call.1
= control target key start
LH: loop header
LB: loop body
LE: loop exit
PB: predicated region body
PF: predicated region fallthrough
CT: control target
= control target key end

     0   :  { %s328_s0 = inlined_call_operand.vmem [shape: f32[8,256], index: 0, kind: input, shape index: {}]   ;;  %s329_s1 = inlined_call_operand.vmem [shape: f32[4,8], index: 1, kind: input, shape index: {}]   ;;  %s330_s2 = inlined_call_operand.vmem [shape: f32[4,1], index: 2, kind: input, shape index: {}]   ;;  %s331_s3 = inlined_call_operand.vmem [shape: f32[8,4], index: 3, kind: input, shape index: {}]   ;;  %s332_s4 = inlined_call_operand.vmem [shape: f32[8,1], index: 4, kind: input, shape index: {}]   ;;  %s333_s5 = inlined_call_operand.hbm [shape: f32[8,256], index: 5, kind: output, shape index: {}]  }
   0x1   :  { %v21_v0 = vld [vmem:[%s328_s0] sm:$0xff]  ;;  %v22_v1 = vld [vmem:[%s328_s0 + $0x8] sm:$0xff] }
   0x2   :  { %10 = vsyncpa [#allocation3], 0  ;;  %v23_v2 = vadd.f32 %v22_v1, %v21_v0  ;;  %v264_v3 = vmov 0.0   ;;  %vm265_vm0 = vmmov 0   ;;  %v27_v6 = vld [vmem:[%s329_s1] sm:$0xf] }
   0x3   :  { %221 = vmatprep.subr.mxu0 %v264_v3  ;;  %226 = vmatprep.subr.mxu1 %v264_v3  ;;  %vm29_vm1 = vcmask 64512   ;;  %v28_v7 = vld [vmem:[%s330_s2] sm:$0xf]  ;;  %vm110_vm2 = vcmask 1043456   ;;  %vm106_vm3 = vcmask 31744   ;;  %v266_v13 = vmov 0  }
   0x4   :  { %24 = vadd.xlane.f32.xlu0 %v23_v2  ;;  %223 = vmatprep.mubr.msk.f32.mxu0 %vm265_vm0, %v264_v3  ;;  %v104_v12 = vld [vmem:[%s331_s3] sm:$0xff]  ;;  %s267_s2 = smov [#allocation2]  }
   0x5   :  { %228 = vmatprep.mubr.msk.f32.mxu1 %vm265_vm0, %v264_v3  ;;  %235 = vset.pattern.permute.xlu0 %v266_v13  ;;  %v105_v14 = vld [vmem:[%s332_s4] sm:$0xff]  ;;  %s205_s3 = sshll.u32 %s267_s2, 4  ;;  %s206_s3 = int_to_ptr.vmem [resolvable:$true] %s205_s3 }
   0x6   :  { %s240_s28 = scalar_lea.vmem %s206_s3, 256  ;;  %p245_p1 = scmp.lt.s32.totalorder %s206_s3, %s206_s3 }
   0x7   :  { %p241_p0 = scmp.ne.s32.totalorder %s206_s3, %s240_s28  ;;  %p246_p2 = scmp.lt.s32.totalorder %s240_s28, %s240_s28 }
   0x9   :  { %p247_p3 = por %p246_p2, %p245_p1 }
   0xb   :  { %p248_p4 = pnand %p247_p3, %p241_p0 }
  0x91   :  { %v25_v4 = vpop.xlane.xlu0 %24 }
  0x92   :  { %v26_v5 = vmul.f32 0.00390625, %v25_v4 }
  0x94   :  { %222 = vmatpush3.msra.mxu0 %v26_v5 }
  0x95   :  { %224 = vmatmul.mubr.msk.f32.vlgmr.msra.gmra.mrb[0].mxu0 %vm29_vm1, %v27_v6 }
 0x168   :  { %v99_v8 = vpop.f32.mrb[0].mxu0 }
 0x169   :  { %v100_v9 = vadd.f32 %v99_v8, %v28_v7  ;;  %v225_v10 = vpop.f32.mrb[1].mxu0 }
 0x16b   :  { %v103_v11 = vmax.f32 %v100_v9, 0.0 }
 0x16d   :  { %227 = vmatpush3.msk.msra.mxu1 %vm110_vm2, %v103_v11 }
 0x16e   :  { %229 = vmatmul.mubr.msk.f32.vlgmr.msra.gmra.mrb[0].mxu1 %vm106_vm3, %v104_v12 }
 0x241   :  { %v180_v15 = vpop.f32.mrb[0].mxu1 }
 0x242   :  { %v181_v16 = vadd.f32 %v180_v15, %v105_v14  ;;  %v230_v17 = vpop.f32.mrb[1].mxu1 }
 0x244   :  { %v216_v18 = vmul.f32 -1.442695, %v181_v16 }
 0x246   :  { %236 = vpow2.f32 %v216_v18 }
 0x250   :  { %v237_v19 = vpop.eup %236 }
 0x251   :  { %v187_v20 = vadd.f32 1.0, %v237_v19 }
 0x253   :  { %238 = vrcp.f32 %v187_v20 }
 0x25d   :  { %v239_v21 = vpop.eup %238 }
 0x25e   :  { %192 = vperm.xlu0 %235, %v239_v21  }
 0x2dd   :  { %v193_v22 = vpop.permute.xlu0 %192 }
 0x2de   :  { %v195_v23 = vmul.f32 %v193_v22, %v21_v0  ;;  %v196_v24 = vmul.f32 %v193_v22, %v22_v1 }
 0x2e0   :  { %197 = vst [vmem:[#allocation2] sm:$0xff] %v195_v23  ;;  %198 = vst [vmem:[#allocation2 + $0x8] sm:$0xff] %v196_v24 }
 0x2e1   :  { %251 = shalt.err (!%p248_p4)
}
 0x2e2   :  { %s252_s30 = scalar_lea.hbm %s333_s5, 256 }
 0x2e3   :  { %p253_p5 = scmp.ne.s32.totalorder %s333_s5, %s252_s30  ;;  %p256_p6 = scmp.lt.u32.totalorder %s252_s30, %s333_s5 }
 0x2e5   :  { %p258_p7 = pnand %p256_p6, %p253_p5 }
 0x2e7   :  { %261 = shalt.err (!%p258_p7)
}
 0x2e8   :  { %208 = dma.vmem_to_hbm [thread:$0]  %s206_s3, 256, %s333_s5, [#allocation3]  }
 0x2e9   :  { %262 = dma.done.wait [#allocation3], 256  }
 0x2ea   :  { %263 = vsyncadd [#allocation3], 4294967040 }
 0x2eb   :  { %212 = vsyncpa [#allocation3], 1 }

</bundles_post_ra>
